<compile_context>
chip_gen: v5e
topology: v5e:2x2
jax: 0.10.0
libtpu: 0.0.40
codegen_flags: <defaults>
</compile_context>

<pallas_src>
import numpy as np
import jax
import jax.numpy as jnp
from jax.experimental import pallas as pl
from jax.experimental.pallas import tpu as pltpu


# ----------------------------- config (small, consistent with module) -------
B = 2
DIM = 32
HEADS = 2
HEAD_DIM = 16
INNER_DIM = HEADS * HEAD_DIM          # 32
WS = 4                                # window_size
NH = NW = 8                           # spatial size (multiple of window_size)
NW_H, NW_W = NH // WS, NW // WS       # windows per axis (2, 2)
NWIN = NW_H * NW_W                    # 4 windows
NTOK = WS * WS                        # 16 tokens per window
NTOKENS = NWIN * NTOK                 # 64 tokens per sample
TOT = B * NTOKENS                     # 128 tokens total (both samples)
SHIFTED = True
REL_POS = True
DISP = WS // 2                        # displacement
SCALE = HEAD_DIM ** (-0.5)
MASK_VALUE = -1e30                    # finite stand-in for -inf inside kernel


# ----------------------------- host-side helpers (numpy) --------------------
def create_mask_np(window_size, displacement, upper_lower, left_right):
    n = window_size ** 2
    mask = np.zeros((n, n), dtype=np.float32)
    if upper_lower:
        mask[-displacement * window_size:, :-displacement * window_size] = -np.inf
        mask[:-displacement * window_size, -displacement * window_size:] = -np.inf
    if left_right:
        mask = mask.reshape(window_size, window_size, window_size, window_size)
        mask[:, -displacement:, :, :-displacement] = -np.inf
        mask[:, :-displacement, :, -displacement:] = -np.inf
        mask = mask.reshape(n, n)
    return mask


def relative_indices_np(window_size):
    idx = np.array([[x, y] for x in range(window_size) for y in range(window_size)])
    rel = idx[None, :, :] - idx[:, None, :]
    return rel + window_size - 1                      # (NTOK, NTOK, 2)


def per_window_mask_np():
    """Fold the torch in-place mask additions into a (NWIN, NTOK, NTOK) tensor."""
    m = np.zeros((NWIN, NTOK, NTOK), dtype=np.float32)
    if SHIFTED:
        ul = create_mask_np(WS, DISP, True, False)
        lr = create_mask_np(WS, DISP, False, True)
        for wh in range(NW_H):
            for ww in range(NW_W):
                w = wh * NW_W + ww
                if wh == NW_H - 1:            # dots[:, :, -nw_w:]       += upper_lower
                    m[w] += ul
                if ww == NW_W - 1:            # dots[:, :, nw_w-1::nw_w] += left_right
                    m[w] += lr
    return m


def dense_bias_np(pos_bias_np):
    """(TOT, TOT) bias: block-diagonal per-window rel-pos bias + shift mask,
    MASK_VALUE everywhere else (cross-window / cross-sample)."""
    blk = pos_bias_np[None] + per_window_mask_np()            # (NWIN, NTOK, NTOK)
    blk = np.maximum(blk, MASK_VALUE)                         # -inf -> -1e30
    dense = np.full((TOT, TOT), MASK_VALUE, dtype=np.float32)
    for s in range(B):
        for w in range(NWIN):
            r = s * NTOKENS + w * NTOK
            dense[r:r + NTOK, r:r + NTOK] = blk[w]
    return dense


# ----------------------------- fused Pallas kernel ---------------------------
def _fused_kernel(x_ref, wqkv_ref, wo_ref, bo_ref, bias_ref, o_ref):
    # x_ref   : (TOT, DIM)           f32   window-ordered tokens (both samples)
    # wqkv_ref: (DIM, 3*INNER_DIM)   bf16  [Wq*scale | Wk | Wv], head-major cols
    # wo_ref  : (INNER_DIM, DIM)     bf16  output projection
    # bo_ref  : (1, DIM)             f32   output bias
    # bias_ref: (TOT, TOT)           f32   block-diag rel-pos bias + masks
    # o_ref   : (TOT, DIM)           f32
    xf = x_ref[...].astype(jnp.bfloat16)                       # (128, 32)
    bias = bias_ref[...]                                       # (128, 128) f32

    # fused qkv projection: one MXU matmul, 96-lane-wide result
    qkv = jnp.dot(xf, wqkv_ref[...],
                  preferred_element_type=jnp.float32)          # (128, 96)

    head_out = []
    for h in range(HEADS):                                     # static unroll (2)
        q = qkv[:, h * HEAD_DIM:(h + 1) * HEAD_DIM].astype(jnp.bfloat16)
        k = qkv[:, INNER_DIM + h * HEAD_DIM:
                   INNER_DIM + (h + 1) * HEAD_DIM].astype(jnp.bfloat16)
        v = qkv[:, 2 * INNER_DIM + h * HEAD_DIM:
                   2 * INNER_DIM + (h + 1) * HEAD_DIM].astype(jnp.bfloat16)

        # dense attention over all 128 tokens; off-window blocks masked by bias
        dots = jnp.einsum('id,jd->ij', q, k,
                          preferred_element_type=jnp.float32) + bias  # (128, 128)

        # softmax in f32 (row max is always finite: diagonal block unmasked)
        m = jnp.max(dots, axis=-1, keepdims=True)
        p = jnp.exp(dots - m)
        s = jnp.sum(p, axis=-1, keepdims=True)
        p = p * pl.reciprocal(s, approx=True)                  # EUP slot

        head_out.append(jnp.dot(p.astype(jnp.bfloat16), v,
                                preferred_element_type=jnp.float32))  # (128, 16)

    ow = jnp.concatenate(head_out, axis=-1).astype(jnp.bfloat16)      # (128, 32)
    out = jnp.dot(ow, wo_ref[...],
                  preferred_element_type=jnp.float32) + bo_ref[...]   # (128, 32)
    o_ref[...] = out.astype(o_ref.dtype)


def fused_window_attention(xs, wqkv_b, wo_b, b_out2, bias_dense):
    """xs: (TOT, DIM) window-ordered tokens (both samples) -> (TOT, DIM)."""
    T, C = xs.shape
    return pl.pallas_call(
        _fused_kernel,
        out_shape=jax.ShapeDtypeStruct((T, C), xs.dtype),
        grid=(1,),                                 # single step: no pipeline loop
        in_specs=[
            pl.BlockSpec((T, C), lambda i: (0, 0)),
            pl.BlockSpec(wqkv_b.shape, lambda i: (0, 0)),
            pl.BlockSpec(wo_b.shape, lambda i: (0, 0)),
            pl.BlockSpec(b_out2.shape, lambda i: (0, 0)),
            pl.BlockSpec(bias_dense.shape, lambda i: (0, 0)),
        ],
        out_specs=pl.BlockSpec((T, C), lambda i: (0, 0)),
        compiler_params=pltpu.CompilerParams(
            dimension_semantics=("arbitrary",)),
    )(xs, wqkv_b, wo_b, b_out2, bias_dense)


# ----------------------------- wrapper (layout plumbing only) ----------------
def _to_window_tokens(x):
    # (B, NH, NW, C) -> (B, NWIN*NTOK, C), rows ordered (nw_h, nw_w, w_h, w_w)
    b, _, _, c = x.shape
    x = x.reshape(b, NW_H, WS, NW_W, WS, c)
    x = x.transpose(0, 1, 3, 2, 4, 5)
    return x.reshape(b, NWIN * NTOK, c)


def _from_window_tokens(x):
    b, _, c = x.shape
    x = x.reshape(b, NW_H, NW_W, WS, WS, c)
    x = x.transpose(0, 1, 3, 2, 4, 5)
    return x.reshape(b, NH, NW, c)


@jax.jit
def forward_pallas(x, wqkv_b, wo_b, b_out2, bias_dense):
    if SHIFTED:
        x = jnp.roll(x, shift=(-DISP, -DISP), axis=(1, 2))
    xw = _to_window_tokens(x)                      # XLA fuses roll + permute
    xs = xw.reshape(B * NTOKENS, DIM)              # (128, 32) slab, both samples
    os_ = fused_window_attention(xs, wqkv_b, wo_b, b_out2, bias_dense)
    ow = os_.reshape(B, NTOKENS, DIM)
    out = _from_window_tokens(ow)
    if SHIFTED:
        out = jnp.roll(out, shift=(DISP, DISP), axis=(1, 2))
    return out


# ----------------------------- pure-JAX f32 reference ------------------------
def forward_reference(x, w_qkv, w_out, b_out, pos_bias, win_mask):
    if SHIFTED:
        x = jnp.roll(x, shift=(-DISP, -DISP), axis=(1, 2))
    qkv = x @ w_qkv                                           # (B, NH, NW, 3*INNER)
    q, k, v = jnp.split(qkv, 3, axis=-1)

    def split(t):
        t = t.reshape(B, NW_H, WS, NW_W, WS, HEADS, HEAD_DIM)
        t = t.transpose(0, 5, 1, 3, 2, 4, 6)
        return t.reshape(B, HEADS, NWIN, NTOK, HEAD_DIM)

    qw, kw, vw = split(q), split(k), split(v)
    dots = jnp.einsum('bhwid,bhwjd->bhwij', qw, kw) * SCALE
    dots = dots + pos_bias[None, None, None] + win_mask[None, None]
    attn = jax.nn.softmax(dots, axis=-1)
    ow = jnp.einsum('bhwij,bhwjd->bhwid', attn, vw)
    ow = ow.reshape(B, HEADS, NW_H, NW_W, WS, WS, HEAD_DIM)
    ow = ow.transpose(0, 2, 4, 3, 5, 1, 6).reshape(B, NH, NW, INNER_DIM)
    out = ow @ w_out + b_out
    if SHIFTED:
        out = jnp.roll(out, shift=(DISP, DISP), axis=(1, 2))
    return out


# ----------------------------- main ------------------------------------------
if __name__ == "__main__":
    key = jax.random.PRNGKey(0)
    k1, k2, k3, k4, k5 = jax.random.split(key, 5)

    # synthetic parameters (shapes from WindowAttention.__init__)
    w_qkv = jax.random.normal(k1, (DIM, 3 * INNER_DIM), jnp.float32) * 0.05  # to_qkv (no bias)
    w_out = jax.random.normal(k2, (INNER_DIM, DIM), jnp.float32) * 0.05      # to_out weight
    b_out = jax.random.normal(k3, (DIM,), jnp.float32) * 0.05                # to_out bias
    pos_embedding = jax.random.normal(k4, (2 * WS - 1, 2 * WS - 1), jnp.float32)

    x = jax.random.normal(k5, (B, NH, NW, DIM), jnp.float32)

    # relative positional bias gather + shift masks (host-side glue)
    rel_idx = relative_indices_np(WS)                                        # (NTOK, NTOK, 2)
    pos_bias_np = np.asarray(pos_embedding)[rel_idx[:, :, 0],
                                            rel_idx[:, :, 1]].astype(np.float32)
    pos_bias = jnp.asarray(pos_bias_np)                                      # (NTOK, NTOK)
    win_mask = jnp.asarray(per_window_mask_np(), jnp.float32)                # (NWIN, NTOK, NTOK)

    # kernel-side packed parameters
    bias_dense = jnp.asarray(dense_bias_np(pos_bias_np))                     # (128, 128)
    w_qkv_scaled = np.asarray(w_qkv).copy()
    w_qkv_scaled[:, :INNER_DIM] *= SCALE                                     # fold scale into Wq
    wqkv_b = jnp.asarray(w_qkv_scaled, jnp.bfloat16)                         # (32, 96)
    wo_b = jnp.asarray(w_out, jnp.bfloat16)                                  # (32, 32)
    b_out2 = b_out.reshape(1, DIM)

    out = forward_pallas(x, wqkv_b, wo_b, b_out2, bias_dense)
    out = jax.block_until_ready(out)

    ref = forward_reference(x, w_qkv, w_out, b_out, pos_bias, win_mask)
    ref = jax.block_until_ready(ref)

    assert out.shape == (B, NH, NW, DIM)
    # bf16 MXU operands (f32 accumulation) vs a pure-f32 reference -> loosened tol.
    np.testing.assert_allclose(np.asarray(out), np.asarray(ref), rtol=2e-2, atol=2e-2)

    print("KERNEL_OK")
</pallas_src>

<mosaic_0001>
module attributes {stable_mosaic.version = 11 : i64} {
  func.func @_fused_kernel(%arg0: i32, %arg1: memref<128x32xf32, #tpu.memory_space<vmem>>, %arg2: memref<32x96xbf16, #tpu.memory_space<vmem>>, %arg3: memref<32x32xbf16, #tpu.memory_space<vmem>>, %arg4: memref<1x32xf32, #tpu.memory_space<vmem>>, %arg5: memref<128x128xf32, #tpu.memory_space<vmem>>, %arg6: memref<128x32xf32, #tpu.memory_space<vmem>>) attributes {dimension_semantics = [#tpu.dimension_semantics<arbitrary>], iteration_bounds = array<i64: 1>, scalar_prefetch = 0 : i64, scratch_operands = 0 : i64, tpu.core_type = #tpu.core_type<tc>, window_params = [{pipeline_mode = #tpu.pipeline_mode<synchronous>, transform_indices = @transform_0, window_bounds = array<i64: 128, 32>}, {pipeline_mode = #tpu.pipeline_mode<synchronous>, transform_indices = @transform_1, window_bounds = array<i64: 32, 96>}, {pipeline_mode = #tpu.pipeline_mode<synchronous>, transform_indices = @transform_2, window_bounds = array<i64: 32, 32>}, {pipeline_mode = #tpu.pipeline_mode<synchronous>, transform_indices = @transform_3, window_bounds = array<i64: 1, 32>}, {pipeline_mode = #tpu.pipeline_mode<synchronous>, transform_indices = @transform_4, window_bounds = array<i64: 128, 128>}, {pipeline_mode = #tpu.pipeline_mode<synchronous>, transform_indices = @transform_5, window_bounds = array<i64: 128, 32>}]} {
    %c0 = arith.constant 0 : index
    %c0_0 = arith.constant 0 : index
    %0 = vector.load %arg1[%c0, %c0_0] : memref<128x32xf32, #tpu.memory_space<vmem>>, vector<128x32xf32>
    %1 = arith.truncf %0 : vector<128x32xf32> to vector<128x32xbf16>
    %c0_1 = arith.constant 0 : index
    %c0_2 = arith.constant 0 : index
    %2 = vector.load %arg5[%c0_1, %c0_2] : memref<128x128xf32, #tpu.memory_space<vmem>>, vector<128x128xf32>
    %c0_3 = arith.constant 0 : index
    %c0_4 = arith.constant 0 : index
    %3 = vector.load %arg2[%c0_3, %c0_4] : memref<32x96xbf16, #tpu.memory_space<vmem>>, vector<32x96xbf16>
    %cst = arith.constant dense<0.000000e+00> : vector<128x96xf32>
    %4 = tpu.matmul %1, %3, %cst {dimension_numbers = #tpu.dot_dimension_numbers<[1], [0], [0], [1], [0, 0, 1, 1], [], []>} : vector<128x32xbf16>, vector<32x96xbf16>, vector<128x96xf32> -> vector<128x96xf32>
    %5 = vector.extract_strided_slice %4 {offsets = [0, 0], sizes = [128, 16], strides = [1, 1]} : vector<128x96xf32> to vector<128x16xf32>
    %6 = arith.truncf %5 : vector<128x16xf32> to vector<128x16xbf16>
    %7 = vector.extract_strided_slice %4 {offsets = [0, 32], sizes = [128, 16], strides = [1, 1]} : vector<128x96xf32> to vector<128x16xf32>
    %8 = arith.truncf %7 : vector<128x16xf32> to vector<128x16xbf16>
    %9 = vector.extract_strided_slice %4 {offsets = [0, 64], sizes = [128, 16], strides = [1, 1]} : vector<128x96xf32> to vector<128x16xf32>
    %10 = arith.truncf %9 : vector<128x16xf32> to vector<128x16xbf16>
    "tpu.trace_start"() <{level = 10 : i32, message = "id,jd->ij"}> : () -> ()
    %cst_5 = arith.constant dense<0.000000e+00> : vector<128x128xf32>
    %11 = tpu.matmul %6, %8, %cst_5 {dimension_numbers = #tpu.dot_dimension_numbers<[1], [1], [0], [0], [0, 0, 1, 0], [], []>} : vector<128x16xbf16>, vector<128x16xbf16>, vector<128x128xf32> -> vector<128x128xf32>
    "tpu.trace_stop"() : () -> ()
    %12 = arith.addf %11, %2 : vector<128x128xf32>
    %cst_6 = arith.constant dense<0xFF800000> : vector<128xf32>
    %13 = vector.multi_reduction <maximumf>, %12, %cst_6 [1] : vector<128x128xf32> to vector<128xf32>
    %14 = vector.shape_cast %13 : vector<128xf32> to vector<128x1xf32>
    %15 = vector.broadcast %14 : vector<128x1xf32> to vector<128x128xf32>
    %16 = arith.subf %12, %15 : vector<128x128xf32>
    %17 = math.exp %16 : vector<128x128xf32>
    %cst_7 = arith.constant dense<0.000000e+00> : vector<128xf32>
    %18 = vector.multi_reduction <add>, %17, %cst_7 [1] : vector<128x128xf32> to vector<128xf32>
    %19 = vector.shape_cast %18 : vector<128xf32> to vector<128x1xf32>
    %20 = tpu.reciprocal %19 {approx = true} : vector<128x1xf32> -> vector<128x1xf32>
    %21 = vector.broadcast %20 : vector<128x1xf32> to vector<128x128xf32>
    %22 = arith.mulf %17, %21 : vector<128x128xf32>
    %23 = arith.truncf %22 : vector<128x128xf32> to vector<128x128xbf16>
    %cst_8 = arith.constant dense<0.000000e+00> : vector<128x16xf32>
    %24 = tpu.matmul %23, %10, %cst_8 {dimension_numbers = #tpu.dot_dimension_numbers<[1], [0], [0], [1], [0, 0, 1, 1], [], []>} : vector<128x128xbf16>, vector<128x16xbf16>, vector<128x16xf32> -> vector<128x16xf32>
    %25 = vector.extract_strided_slice %4 {offsets = [0, 16], sizes = [128, 16], strides = [1, 1]} : vector<128x96xf32> to vector<128x16xf32>
    %26 = arith.truncf %25 : vector<128x16xf32> to vector<128x16xbf16>
    %27 = vector.extract_strided_slice %4 {offsets = [0, 48], sizes = [128, 16], strides = [1, 1]} : vector<128x96xf32> to vector<128x16xf32>
    %28 = arith.truncf %27 : vector<128x16xf32> to vector<128x16xbf16>
    %29 = vector.extract_strided_slice %4 {offsets = [0, 80], sizes = [128, 16], strides = [1, 1]} : vector<128x96xf32> to vector<128x16xf32>
    %30 = arith.truncf %29 : vector<128x16xf32> to vector<128x16xbf16>
    "tpu.trace_start"() <{level = 10 : i32, message = "id,jd->ij"}> : () -> ()
    %cst_9 = arith.constant dense<0.000000e+00> : vector<128x128xf32>
    %31 = tpu.matmul %26, %28, %cst_9 {dimension_numbers = #tpu.dot_dimension_numbers<[1], [1], [0], [0], [0, 0, 1, 0], [], []>} : vector<128x16xbf16>, vector<128x16xbf16>, vector<128x128xf32> -> vector<128x128xf32>
    "tpu.trace_stop"() : () -> ()
    %32 = arith.addf %31, %2 : vector<128x128xf32>
    %cst_10 = arith.constant dense<0xFF800000> : vector<128xf32>
    %33 = vector.multi_reduction <maximumf>, %32, %cst_10 [1] : vector<128x128xf32> to vector<128xf32>
    %34 = vector.shape_cast %33 : vector<128xf32> to vector<128x1xf32>
    %35 = vector.broadcast %34 : vector<128x1xf32> to vector<128x128xf32>
    %36 = arith.subf %32, %35 : vector<128x128xf32>
    %37 = math.exp %36 : vector<128x128xf32>
    %cst_11 = arith.constant dense<0.000000e+00> : vector<128xf32>
    %38 = vector.multi_reduction <add>, %37, %cst_11 [1] : vector<128x128xf32> to vector<128xf32>
    %39 = vector.shape_cast %38 : vector<128xf32> to vector<128x1xf32>
    %40 = tpu.reciprocal %39 {approx = true} : vector<128x1xf32> -> vector<128x1xf32>
    %41 = vector.broadcast %40 : vector<128x1xf32> to vector<128x128xf32>
    %42 = arith.mulf %37, %41 : vector<128x128xf32>
    %43 = arith.truncf %42 : vector<128x128xf32> to vector<128x128xbf16>
    %cst_12 = arith.constant dense<0.000000e+00> : vector<128x16xf32>
    %44 = tpu.matmul %43, %30, %cst_12 {dimension_numbers = #tpu.dot_dimension_numbers<[1], [0], [0], [1], [0, 0, 1, 1], [], []>} : vector<128x128xbf16>, vector<128x16xbf16>, vector<128x16xf32> -> vector<128x16xf32>
    %45 = tpu.concatenate %24, %44 in 1 : vector<128x16xf32>, vector<128x16xf32> -> vector<128x32xf32>
    %46 = arith.truncf %45 : vector<128x32xf32> to vector<128x32xbf16>
    %c0_13 = arith.constant 0 : index
    %c0_14 = arith.constant 0 : index
    %47 = vector.load %arg3[%c0_13, %c0_14] : memref<32x32xbf16, #tpu.memory_space<vmem>>, vector<32x32xbf16>
    %cst_15 = arith.constant dense<0.000000e+00> : vector<128x32xf32>
    %48 = tpu.matmul %46, %47, %cst_15 {dimension_numbers = #tpu.dot_dimension_numbers<[1], [0], [0], [1], [0, 0, 1, 1], [], []>} : vector<128x32xbf16>, vector<32x32xbf16>, vector<128x32xf32> -> vector<128x32xf32>
    %c0_16 = arith.constant 0 : index
    %c0_17 = arith.constant 0 : index
    %49 = vector.load %arg4[%c0_16, %c0_17] : memref<1x32xf32, #tpu.memory_space<vmem>>, vector<1x32xf32>
    %50 = vector.broadcast %49 : vector<1x32xf32> to vector<128x32xf32>
    %51 = arith.addf %48, %50 : vector<128x32xf32>
    %c0_18 = arith.constant 0 : index
    %c0_19 = arith.constant 0 : index
    %52 = vector.load %arg6[%c0_18, %c0_19] : memref<128x32xf32, #tpu.memory_space<vmem>>, vector<128x32xf32>
    tpu.vector_store %arg6[%c0_18, %c0_19], %51 {strides = array<i32>} : memref<128x32xf32, #tpu.memory_space<vmem>>, vector<128x32xf32>,
    return
  }
  func.func @transform_0(%arg0: i32) -> (i32, i32) {
    %c0_i32 = arith.constant 0 : i32
    %c0_i32_0 = arith.constant 0 : i32
    %c0_i32_1 = arith.constant 0 : i32
    return %c0_i32, %c0_i32_0 : i32, i32
  }
  func.func @transform_1(%arg0: i32) -> (i32, i32) {
    %c0_i32 = arith.constant 0 : i32
    %c0_i32_0 = arith.constant 0 : i32
    %c0_i32_1 = arith.constant 0 : i32
    return %c0_i32, %c0_i32_0 : i32, i32
  }
  func.func @transform_2(%arg0: i32) -> (i32, i32) {
    %c0_i32 = arith.constant 0 : i32
    %c0_i32_0 = arith.constant 0 : i32
    %c0_i32_1 = arith.constant 0 : i32
    return %c0_i32, %c0_i32_0 : i32, i32
  }
  func.func @transform_3(%arg0: i32) -> (i32, i32) {
    %c0_i32 = arith.constant 0 : i32
    %c0_i32_0 = arith.constant 0 : i32
    %c0_i32_1 = arith.constant 0 : i32
    return %c0_i32, %c0_i32_0 : i32, i32
  }
  func.func @transform_4(%arg0: i32) -> (i32, i32) {
    %c0_i32 = arith.constant 0 : i32
    %c0_i32_0 = arith.constant 0 : i32
    %c0_i32_1 = arith.constant 0 : i32
    return %c0_i32, %c0_i32_0 : i32, i32
  }
  func.func @transform_5(%arg0: i32) -> (i32, i32) {
    %c0_i32 = arith.constant 0 : i32
    %c0_i32_0 = arith.constant 0 : i32
    %c0_i32_1 = arith.constant 0 : i32
    return %c0_i32, %c0_i32_0 : i32, i32
  }
}

</mosaic_0001>

<bundles_post_ra>
// kernel: forward_pallas.1
= control target key start
LH: loop header
LB: loop body
LE: loop exit
PB: predicated region body
PF: predicated region fallthrough
CT: control target
= control target key end

     0   :  { %vm77_vm0 = vcmask 261120   ;;  %s1312_s28 = smov 112   ;;  %s1313_s29 = smov 64   ;;  %vm183_vm1 = vcmask 130048   ;;  %s1969_s1 = inlined_call_operand.vmem [shape: bf16[32,96], index: 1, kind: input, shape index: {}]   ;;  %s1970_s0 = inlined_call_operand.vmem [shape: f32[128,32], index: 0, kind: input, shape index: {}]   ;;  %s1971_s4 = inlined_call_operand.vmem [shape: f32[128,128], index: 4, kind: input, shape index: {}]   ;;  %s1972_s2 = inlined_call_operand.vmem [shape: bf16[32,32], index: 2, kind: input, shape index: {}]   ;;  %s1973_s3 = inlined_call_operand.vmem [shape: f32[1,32], index: 3, kind: input, shape index: {}]   ;;  %s1974_s5 = inlined_call_operand.vmem [shape: f32[128,32], index: 5, kind: output, shape index: {}]  }
   0x1   :  { %v1110_v0 = vld [vmem:[%s1969_s1 + $0x8] sm:$0xff]  ;;  %v1109_v1 = vld [vmem:[%s1969_s1] sm:$0xff]  ;;  %v31_v8 = vld [vmem:[%s1970_s0 + $0x50] sm:$0xff]  ;;  %s1310_s1 = smov 96   ;;  %s1314_s30 = smov 48  }
   0x2   :  { %1114 = vmatpush.bf16.msra.mxu3 %v1110_v0  ;;  %v29_v2 = vld [vmem:[%s1970_s0 + $0x40] sm:$0xff]  ;;  %v30_v3 = vld [vmem:[%s1970_s0 + $0x48] sm:$0xff]  ;;  %1113 = vmatpush.bf16.msra.mxu1 %v1110_v0  ;;  %v32_v9 = vld [vmem:[%s1970_s0 + $0x58] sm:$0xff] }
   0x3   :  { %108 = vmatpush.bf16.msra.mxu0 %v1110_v0  ;;  %v41_v4 = vpack.c.bf16 %v30_v3, %v29_v2  ;;  %v25_v5 = vld [vmem:[%s1970_s0 + $0x20] sm:$0xff]  ;;  %v26_v6 = vld [vmem:[%s1970_s0 + $0x28] sm:$0xff]  ;;  %v42_v10 = vpack.c.bf16 %v32_v9, %v31_v8  ;;  %v27_v13 = vld [vmem:[%s1970_s0 + $0x30] sm:$0xff] }
   0x4   :  { %v39_v7 = vpack.c.bf16 %v26_v6, %v25_v5  ;;  %v21_v11 = vld [vmem:[%s1970_s0] sm:$0xff]  ;;  %v22_v12 = vld [vmem:[%s1970_s0 + $0x8] sm:$0xff]  ;;  %v28_v15 = vld [vmem:[%s1970_s0 + $0x38] sm:$0xff] }
   0x5   :  { %v37_v14 = vpack.c.bf16 %v22_v12, %v21_v11  ;;  %v40_v16 = vpack.c.bf16 %v28_v15, %v27_v13  ;;  %v33_v17 = vld [vmem:[%s1970_s0 + $0x60] sm:$0xff]  ;;  %v34_v18 = vld [vmem:[%s1970_s0 + $0x68] sm:$0xff]  ;;  %v23_v20 = vld [vmem:[%s1970_s0 + $0x10] sm:$0xff] }
   0x6   :  { %1116 = vmatpush.bf16.msra.mxu3 %v1109_v1  ;;  %1115 = vmatpush.bf16.msra.mxu1 %v1109_v1  ;;  %v43_v19 = vpack.c.bf16 %v34_v18, %v33_v17  ;;  %v24_v21 = vld [vmem:[%s1970_s0 + $0x18] sm:$0xff]  ;;  %v35_v23 = vld [vmem:[%s1970_s0 + $0x70] sm:$0xff] }
   0x7   :  { %109 = vmatpush.bf16.msra.mxu0 %v1109_v1  ;;  %v38_v22 = vpack.c.bf16 %v24_v21, %v23_v20  ;;  %v36_v24 = vld [vmem:[%s1970_s0 + $0x78] sm:$0xff]  ;;  %s1311_s0 = smov 80  }
   0x8   :  { %v44_v25 = vpack.c.bf16 %v36_v24, %v35_v23 }
   0x9   :  { %1073 = vmatmul.msk.bf16.vlgmr.msra.gmra.mxu3 %vm77_vm0, %v41_v4  ;;  %1071 = vmatmul.msk.bf16.vlgmr.msra.gmra.mxu1 %vm77_vm0, %v39_v7 }
   0xa   :  { %1069 = vmatmul.msk.bf16.vlgmr.msra.gmra.mxu0 %vm77_vm0, %v37_v14 }
  0x19   :  { %1074 = vmatmul.msk.bf16.gmra.mxu3 %vm77_vm0, %v42_v10  ;;  %1072 = vmatmul.msk.bf16.gmra.mxu1 %vm77_vm0, %v40_v16 }
  0x1a   :  { %1070 = vmatmul.msk.bf16.gmra.mxu0 %vm77_vm0, %v38_v22 }
  0x29   :  { %1075 = vmatmul.msk.bf16.gmra.mxu3 %vm77_vm0, %v43_v19 }
  0x39   :  { %1076 = vmatmul.msk.bf16.gmra.mxu3 %vm77_vm0, %v44_v25 }
  0x86   :  { %v121_v31 = vpop.f32.mrf.mxu1 }
  0x87   :  { %v111_v37 = vpop.f32.mrf.mxu0 }
  0x8c   :  { %v131_v26 = vpop.f32.mrf.mxu3 }
  0x8e   :  { %v123_v34 = vpop.f32.mrf.mxu1 }
  0x8f   :  { %v1416_v35 = vpack.c.bf16 %v123_v34, %v121_v31  ;;  %v113_v41 = vpop.f32.mrf.mxu0 }
  0x90   :  { %v1432_v45 = vpack.c.bf16 %v113_v41, %v111_v37  ;;  %v45_v41 = vld [vmem:[%s1971_s4] sm:$0xff] }
  0x94   :  { %v133_v27 = vpop.f32.mrf.mxu3 }
  0x95   :  { %v1412_v33 = vpack.c.bf16 %v133_v27, %v131_v26 }
  0x96   :  { %v126_v39 = vpop.f32.mrf.mxu1 }
  0x97   :  { %v116_v47 = vpop.f32.mrf.mxu0 }
  0x9c   :  { %v136_v28 = vpop.f32.mrf.mxu3 }
  0x9e   :  { %v128_v43 = vpop.f32.mrf.mxu1 }
  0x9f   :  { %v1430_v44 = vpack.c.bf16 %v128_v43, %v126_v39  ;;  %v118_v48 = vpop.f32.mrf.mxu0 }
  0xa0   :  { %v1446_v49 = vpack.c.bf16 %v118_v48, %v116_v47 }
  0xa4   :  { %v138_v29 = vpop.f32.mrf.mxu3 }
  0xa5   :  { %v1408_v30 = vpack.c.bf16 %v138_v29, %v136_v28 }
  0xa7   :  { %177 = vrot.lane.b32.xlu1 %v1408_v30, %s1310_s1 }
  0xac   :  { %v141_v32 = vpop.f32.mrf.mxu3 }
  0xaf   :  { %175 = vrot.lane.b32.xlu1 %v1412_v33, %s1310_s1 }
  0xb4   :  { %v143_v36 = vpop.f32.mrf.mxu3 }
  0xb5   :  { %v1434_v46 = vpack.c.bf16 %v143_v36, %v141_v32 }
  0xb7   :  { %171 = vrot.lane.b32.xlu1 %v1416_v35, %s1310_s1 }
  0xbc   :  { %v146_v38 = vpop.f32.mrf.mxu3 }
  0xbf   :  { %530 = vrot.lane.b32.xlu1 %v1412_v33, %s1311_s0 }
  0xc4   :  { %v148_v40 = vpop.f32.mrf.mxu3 }
  0xc5   :  { %v1422_v42 = vpack.c.bf16 %v148_v40, %v146_v38 }
  0xc7   :  { %536 = vrot.lane.b32.xlu2 %v1422_v42, %s1311_s0  ;;  %181 = vrot.lane.b32.xlu0 %v1422_v42, %s1310_s1 }
  0xc8   :  { %526 = vrot.lane.b32.xlu1 %v1416_v35, %s1311_s0 }
  0xcf   :  { %179 = vrot.lane.b32.xlu0 %v1434_v46, %s1310_s1  ;;  %173 = vrot.lane.b32.xlu2 %v1430_v44, %s1310_s1 }
  0xd0   :  { %506 = vrot.lane.b32.xlu1 %v1432_v45, %s1312_s28 }
  0xd7   :  { %534 = vrot.lane.b32.xlu0 %v1434_v46, %s1311_s0  ;;  %532 = vrot.lane.b32.xlu2 %v1408_v30, %s1311_s0 }
  0xd8   :  { %512 = vrot.lane.b32.xlu1 %v1430_v44, %s1312_s28 }
  0xdf   :  { %167 = vrot.lane.b32.xlu2 %v1432_v45, %s1310_s1  ;;  %169 = vrot.lane.b32.xlu0 %v1446_v49, %s1310_s1 }
  0xe0   :  { %518 = vrot.lane.b32.xlu1 %v1434_v46, %s1312_s28 }
  0xe7   :  { %524 = vrot.lane.b32.xlu2 %v1446_v49, %s1311_s0  ;;  %528 = vrot.lane.b32.xlu0 %v1430_v44, %s1311_s0 }
  0xe8   :  { %445 = vrot.lane.b32.xlu1 %v1434_v46, %s1313_s29 }
  0xef   :  { %508 = vrot.lane.b32.xlu2 %v1446_v49, %s1312_s28  ;;  %522 = vrot.lane.b32.xlu0 %v1432_v45, %s1311_s0 }
  0xf0   :  { %433 = vrot.lane.b32.xlu1 %v1432_v45, %s1313_s29 }
  0xf7   :  { %514 = vrot.lane.b32.xlu2 %v1412_v33, %s1312_s28  ;;  %510 = vrot.lane.b32.xlu0 %v1416_v35, %s1312_s28 }
  0xf8   :  { %795 = vrot.lane.b32.xlu1 %v1412_v33, %s1314_s30 }
  0xff   :  { %443 = vrot.lane.b32.xlu2 %v1408_v30, %s1313_s29  ;;  %516 = vrot.lane.b32.xlu0 %v1408_v30, %s1312_s28 }
 0x100   :  { %793 = vrot.lane.b32.xlu1 %v1430_v44, %s1314_s30 }
 0x107   :  { %435 = vrot.lane.b32.xlu2 %v1446_v49, %s1313_s29  ;;  %441 = vrot.lane.b32.xlu0 %v1412_v33, %s1313_s29 }
 0x108   :  { %801 = vrot.lane.b32.xlu1 %v1422_v42, %s1314_s30 }
 0x10f   :  { %799 = vrot.lane.b32.xlu2 %v1434_v46, %s1314_s30  ;;  %439 = vrot.lane.b32.xlu0 %v1430_v44, %s1313_s29 }
 0x117   :  { %520 = vrot.lane.b32.xlu2 %v1422_v42, %s1312_s28  ;;  %437 = vrot.lane.b32.xlu0 %v1416_v35, %s1313_s29 }
 0x119   :  { %v178_v52 = vpop.permute.xlu1 %177 }
 0x11a   :  { %v224_v60 = vsel %vm183_vm1, %v178_v52, 0 }
 0x11f   :  { %797 = vrot.lane.b32.xlu0 %v1408_v30, %s1314_s30 }
 0x121   :  { %v537_v50 = vpop.permute.xlu2 %536  ;;  %v176_v57 = vpop.permute.xlu1 %175 }
 0x122   :  { %v584_v51 = vsel %vm183_vm1, %v537_v50, 0  ;;  %v221_v1 = vsel %vm183_vm1, %v176_v57, 0  ;;  %v48_v57 = vld [vmem:[%s1971_s4 + $0x18] sm:$0xff] }
 0x123   :  { %586 = vmatpush.bf16.xpose.msrb.mxu3 %v584_v51 }
 0x127   :  { %447 = vrot.lane.b32.xlu0 %v1422_v42, %s1313_s29 }
 0x129   :  { %v174_v58 = vpop.permute.xlu2 %173  ;;  %v172_v62 = vpop.permute.xlu1 %171 }
 0x12a   :  { %v218_v5 = vsel %vm183_vm1, %v174_v58, 0  ;;  %v215_v8 = vsel %vm183_vm1, %v172_v62, 0  ;;  %v1546_v62 = vld [vmem:[%s1971_s4 + $0x20] sm:$0xff] }
 0x131   :  { %v533_v63 = vpop.permute.xlu2 %532  ;;  %v531_v3 = vpop.permute.xlu1 %530 }
 0x132   :  { %v578_v2 = vsel %vm183_vm1, %v533_v63, 0  ;;  %v575_v6 = vsel %vm183_vm1, %v531_v3, 0 }
 0x139   :  { %v182_v53 = vpop.permute.xlu0 %181  ;;  %v168_v10 = vpop.permute.xlu2 %167 }
 0x13a   :  { %v230_v54 = vsel %vm183_vm1, %v182_v53, 0  ;;  %v527_v11 = vpop.permute.xlu1 %526  ;;  %v209_v18 = vsel %vm183_vm1, %v168_v10, 0  ;;  %v47_v53 = vld [vmem:[%s1971_s4 + $0x10] sm:$0xff] }
 0x13b   :  { %232 = vmatpush.bf16.xpose.msrb.mxu1 %v230_v54  ;;  %v569_v14 = vsel %vm183_vm1, %v527_v11, 0 }
 0x141   :  { %v180_v55 = vpop.permute.xlu0 %179  ;;  %v525_v15 = vpop.permute.xlu2 %524 }
 0x142   :  { %v227_v56 = vsel %vm183_vm1, %v180_v55, 0  ;;  %v507_v16 = vpop.permute.xlu1 %506  ;;  %v566_v19 = vsel %vm183_vm1, %v525_v15, 0 }
 0x143   :  { %233 = vmatpush.bf16.xpose.msrb.mxu1 %v227_v56 }
 0x149   :  { %v535_v59 = vpop.permute.xlu0 %534  ;;  %v509_v26 = vpop.permute.xlu2 %508 }
 0x14a   :  { %v581_v61 = vsel %vm183_vm1, %v535_v59, 0  ;;  %v513_v22 = vpop.permute.xlu1 %512 }
 0x14b   :  { %234 = vmatpush.bf16.xpose.msrb.mxu1 %v224_v60  ;;  %587 = vmatpush.bf16.xpose.msrb.mxu3 %v581_v61 }
 0x151   :  { %v170_v0 = vpop.permute.xlu0 %169  ;;  %v515_v29 = vpop.permute.xlu2 %514 }
 0x152   :  { %v212_v13 = vsel %vm183_vm1, %v170_v0, 0  ;;  %v519_v24 = vpop.permute.xlu1 %518 }
 0x153   :  { %235 = vmatpush.bf16.xpose.msrb.mxu1 %v221_v1  ;;  %588 = vmatpush.bf16.xpose.msrb.mxu3 %v578_v2  ;;  %v50_v1 = vld [vmem:[%s1971_s4 + $0x28] sm:$0xff] }
 0x159   :  { %v529_v4 = vpop.permute.xlu0 %528  ;;  %v444_v34 = vpop.permute.xlu2 %443 }
 0x15a   :  { %v572_v9 = vsel %vm183_vm1, %v529_v4, 0  ;;  %v446_v27 = vpop.permute.xlu1 %445  ;;  %v1561_v4 = vld [vmem:[%s1971_s4 + $0x30] sm:$0xff] }
 0x15b   :  { %236 = vmatpush.bf16.xpose.msrb.mxu1 %v218_v5  ;;  %589 = vmatpush.bf16.xpose.msrb.mxu3 %v575_v6 }
 0x161   :  { %v523_v7 = vpop.permute.xlu0 %522  ;;  %v436_v38 = vpop.permute.xlu2 %435 }
 0x162   :  { %v563_v21 = vsel %vm183_vm1, %v523_v7, 0  ;;  %v434_v31 = vpop.permute.xlu1 %433  ;;  %v1570_v7 = vld [vmem:[%s1971_s4 + $0x38] sm:$0xff] }
 0x163   :  { %237 = vmatpush.bf16.xpose.msrb.mxu1 %v215_v8  ;;  %590 = vmatpush.bf16.xpose.msrb.mxu3 %v572_v9 }
 0x169   :  { %v511_v12 = vpop.permute.xlu0 %510  ;;  %v800_v40 = vpop.permute.xlu2 %799 }
 0x16a   :  { %v796_v36 = vpop.permute.xlu1 %795 }
 0x16b   :  { %238 = vmatpush.bf16.xpose.msrb.mxu1 %v212_v13  ;;  %591 = vmatpush.bf16.xpose.msrb.mxu3 %v569_v14 }
 0x171   :  { %v1495_v17 = vpop.permute.xlu0 %516 }
 0x172   :  { %v794_v37 = vpop.permute.xlu1 %793 }
 0x173   :  { %239 = vmatpush.bf16.xpose.msrb.mxu1 %v209_v18  ;;  %592 = vmatpush.bf16.xpose.msrb.mxu3 %v566_v19 }
 0x179   :  { %v442_v20 = vpop.permute.xlu0 %441 }
 0x17a   :  { %1077 = vmatmul.msk.bf16.vlgmr.msrb.gmra.mxu1 %vm183_vm1, %v1432_v45  ;;  %v802_v39 = vpop.permute.xlu1 %801 }
 0x17b   :  { %593 = vmatpush.bf16.xpose.msrb.mxu3 %v563_v21 }
 0x181   :  { %v440_v23 = vpop.permute.xlu0 %439 }
 0x182   :  { %1085 = vmatmul.msk.bf16.vlgmr.msrb.gmra.mxu3 %vm183_vm1, %v507_v16 }
 0x189   :  { %v438_v25 = vpop.permute.xlu0 %437 }
 0x18a   :  { %1078 = vmatmul.msk.bf16.gmra.mxu1 %vm183_vm1, %v1446_v49 }
 0x191   :  { %v798_v28 = vpop.permute.xlu0 %797 }
 0x192   :  { %1086 = vmatmul.msk.bf16.gmra.mxu3 %vm183_vm1, %v509_v26 }
 0x199   :  { %v448_v32 = vpop.permute.xlu0 %447 }
 0x19a   :  { %1079 = vmatmul.msk.bf16.gmra.mxu1 %vm183_vm1, %v1416_v35  ;;  %457 = vmatpush.bf16.msrb.mxu0 %v448_v32 }
 0x19b   :  { %1117 = vmatpush.bf16.msra.mxu1 %v448_v32  ;;  %1118 = vmatpush.bf16.msra.mxu2 %v448_v32 }
 0x19e   :  { %458 = vmatpush.bf16.msrb.mxu0 %v446_v27 }
 0x19f   :  { %1119 = vmatpush.bf16.msra.mxu1 %v446_v27  ;;  %1120 = vmatpush.bf16.msra.mxu2 %v446_v27 }
 0x1a2   :  { %459 = vmatpush.bf16.msrb.mxu0 %v444_v34  ;;  %1087 = vmatmul.msk.bf16.gmra.mxu3 %vm183_vm1, %v511_v12 }
 0x1a3   :  { %1121 = vmatpush.bf16.msra.mxu1 %v444_v34  ;;  %1122 = vmatpush.bf16.msra.mxu2 %v444_v34 }
 0x1a6   :  { %460 = vmatpush.bf16.msrb.mxu0 %v442_v20 }
 0x1a7   :  { %1123 = vmatpush.bf16.msra.mxu1 %v442_v20  ;;  %1124 = vmatpush.bf16.msra.mxu2 %v442_v20 }
 0x1aa   :  { %1080 = vmatmul.msk.bf16.gmra.mxu1 %vm183_vm1, %v1430_v44  ;;  %461 = vmatpush.bf16.msrb.mxu0 %v440_v23 }
 0x1ab   :  { %1125 = vmatpush.bf16.msra.mxu1 %v440_v23  ;;  %1126 = vmatpush.bf16.msra.mxu2 %v440_v23 }
 0x1ae   :  { %462 = vmatpush.bf16.msrb.mxu0 %v438_v25 }
 0x1af   :  { %1127 = vmatpush.bf16.msra.mxu1 %v438_v25  ;;  %1128 = vmatpush.bf16.msra.mxu2 %v438_v25 }
 0x1b2   :  { %463 = vmatpush.bf16.msrb.mxu0 %v436_v38  ;;  %1088 = vmatmul.msk.bf16.gmra.mxu3 %vm183_vm1, %v513_v22 }
 0x1b3   :  { %1129 = vmatpush.bf16.msra.mxu1 %v436_v38  ;;  %1130 = vmatpush.bf16.msra.mxu2 %v436_v38 }
 0x1b6   :  { %464 = vmatpush.bf16.msrb.mxu0 %v434_v31 }
 0x1b7   :  { %1131 = vmatpush.bf16.msra.mxu1 %v434_v31  ;;  %1132 = vmatpush.bf16.msra.mxu2 %v434_v31 }
 0x1ba   :  { %811 = vmatpush.bf16.msra.mxu0 %v802_v39  ;;  %1081 = vmatmul.msk.bf16.gmra.mxu1 %vm183_vm1, %v1412_v33  ;;  %v521_v33 = vpop.permute.xlu2 %520 }
 0x1be   :  { %812 = vmatpush.bf16.msra.mxu0 %v800_v40 }
 0x1c2   :  { %813 = vmatpush.bf16.msra.mxu0 %v798_v28  ;;  %1089 = vmatmul.msk.bf16.gmra.mxu3 %vm183_vm1, %v515_v29 }
 0x1c6   :  { %814 = vmatpush.bf16.msra.mxu0 %v796_v36 }
 0x1ca   :  { %815 = vmatpush.bf16.msra.mxu0 %v794_v37  ;;  %1082 = vmatmul.msk.bf16.gmra.mxu1 %vm183_vm1, %v1408_v30 }
 0x1d2   :  { %1090 = vmatmul.msk.bf16.gmra.mxu3 %vm183_vm1, %v1495_v17 }
 0x1da   :  { %1083 = vmatmul.msk.bf16.gmra.mxu1 %vm183_vm1, %v1434_v46  ;;  %v46_v46 = vld [vmem:[%s1971_s4 + $0x8] sm:$0xff] }
 0x1e2   :  { %1091 = vmatmul.msk.bf16.gmra.mxu3 %vm183_vm1, %v519_v24 }
 0x1ea   :  { %1084 = vmatmul.msk.bf16.gmra.mxu1 %vm183_vm1, %v1422_v42 }
 0x1f2   :  { %1092 = vmatmul.msk.bf16.gmra.mxu3 %vm183_vm1, %v521_v33 }
 0x1f7   :  { %v241_v43 = vpop.f32.mrf.mxu1 }
 0x1f8   :  { %v242_v30 = vadd.f32 %v241_v43, %v45_v41 }
 0x1fa   :  { %281 = vmax.xlane.f32.xlu0 %v242_v30 }
 0x1ff   :  { %v243_v48 = vpop.f32.mrf.mxu1 }
 0x200   :  { %v244_v42 = vadd.f32 %v243_v48, %v46_v46 }
 0x205   :  { %v595_v44 = vpop.f32.mrf.mxu3 }
 0x206   :  { %v596_v47 = vadd.f32 %v595_v44, %v45_v41 }
 0x207   :  { %v246_v52 = vpop.f32.mrf.mxu1 }
 0x208   :  { %635 = vmax.xlane.f32.xlu1 %v596_v47  ;;  %v247_v55 = vadd.f32 %v246_v52, %v47_v53 }
 0x20d   :  { %v597_v50 = vpop.f32.mrf.mxu3 }
 0x20e   :  { %v598_v51 = vadd.f32 %v597_v50, %v46_v46 }
 0x20f   :  { %v248_v58 = vpop.f32.mrf.mxu1 }
 0x210   :  { %637 = vmax.xlane.f32.xlu2 %v598_v51  ;;  %283 = vmax.xlane.f32.xlu1 %v244_v42  ;;  %v249_v60 = vadd.f32 %v248_v58, %v48_v57 }
 0x215   :  { %v600_v54 = vpop.f32.mrf.mxu3 }
 0x216   :  { %v1534_v56 = vadd.f32 %v600_v54, %v47_v53 }
 0x217   :  { %v251_v37 = vpop.f32.mrf.mxu1 }
 0x218   :  { %285 = vmax.xlane.f32.xlu2 %v247_v55  ;;  %639 = vmax.xlane.f32.xlu1 %v1534_v56 }
 0x21d   :  { %v602_v59 = vpop.f32.mrf.mxu3 }
 0x21e   :  { %v1540_v61 = vadd.f32 %v602_v59, %v48_v57 }
 0x21f   :  { %v253_v33 = vpop.f32.mrf.mxu1 }
 0x220   :  { %641 = vmax.xlane.f32.xlu0 %v1540_v61  ;;  %287 = vmax.xlane.f32.xlu2 %v249_v60 }
 0x225   :  { %v605_v63 = vpop.f32.mrf.mxu3 }
 0x226   :  { %v1549_v0 = vadd.f32 %v605_v63, %v1546_v62 }
 0x228   :  { %643 = vmax.xlane.f32.xlu0 %v1549_v0 }
 0x22d   :  { %v607_v2 = vpop.f32.mrf.mxu3 }
 0x22e   :  { %v1555_v3 = vadd.f32 %v607_v2, %v50_v1 }
 0x230   :  { %645 = vmax.xlane.f32.xlu2 %v1555_v3 }
 0x235   :  { %v610_v5 = vpop.f32.mrf.mxu3 }
 0x236   :  { %v1564_v6 = vadd.f32 %v610_v5, %v1561_v4 }
 0x238   :  { %647 = vmax.xlane.f32.xlu0 %v1564_v6 }
 0x23d   :  { %v612_v8 = vpop.f32.mrf.mxu3 }
 0x23e   :  { %v1573_v9 = vadd.f32 %v612_v8, %v1570_v7 }
 0x240   :  { %649 = vmax.xlane.f32.xlu2 %v1573_v9 }
 0x245   :  { %v615_v38 = vpop.f32.mrf.mxu3 }
 0x24d   :  { %v617_v41 = vpop.f32.mrf.mxu3 }
 0x255   :  { %v620_v44 = vpop.f32.mrf.mxu3 }
 0x26d   :  { %v282_v10 = vpop.xlane.xlu0 %281 }
 0x26e   :  { %v313_v11 = vsub.f32 %v242_v30, %v282_v10 }
 0x270   :  { %v329_v12 = vmul.f32 1.442695, %v313_v11  ;;  %v1649_v11 = vadd.f32 %v251_v37, %v1546_v62  ;;  %v55_v62 = vld [vmem:[%s1971_s4 + $0x50] sm:$0xff] }
 0x272   :  { %1182 = vpow2.f32 %v329_v12 }
 0x278   :  { %v1576_v13 = vpop.eup %1182 }
 0x279   :  { %361 = vadd.xlane.f32.xlu2 %v1576_v13 }
 0x27b   :  { %v636_v14 = vpop.xlane.xlu1 %635 }
 0x27c   :  { %v667_v15 = vsub.f32 %v596_v47, %v636_v14 }
 0x27e   :  { %v683_v16 = vmul.f32 1.442695, %v667_v15 }
 0x280   :  { %1184 = vpow2.f32 %v683_v16  ;;  %v1659_v16 = vld [vmem:[%s1971_s4 + $0x68] sm:$0xff] }
 0x283   :  { %v638_v17 = vpop.xlane.xlu2 %637  ;;  %v284_v18 = vpop.xlane.xlu1 %283 }
 0x284   :  { %v668_v19 = vsub.f32 %v598_v51, %v638_v17  ;;  %v314_v20 = vsub.f32 %v244_v42, %v284_v18  ;;  %v622_v42 = vpop.f32.mrf.mxu3  ;;  %v56_v51 = vld [vmem:[%s1971_s4 + $0x58] sm:$0xff] }
 0x285   :  { %v1620_v52 = vadd.f32 %v622_v42, %v56_v51 }
 0x286   :  { %v1579_v21 = vpop.eup %1184  ;;  %v685_v22 = vmul.f32 1.442695, %v668_v19  ;;  %v331_v23 = vmul.f32 1.442695, %v314_v20  ;;  %v1668_v19 = vadd.f32 %v620_v44, %v55_v62 }
 0x287   :  { %715 = vadd.xlane.f32.xlu1 %v1579_v21 }
 0x288   :  { %1186 = vpow2.f32 %v685_v22 }
 0x289   :  { %1188 = vpow2.f32 %v331_v23 }
 0x28b   :  { %v286_v24 = vpop.xlane.xlu2 %285  ;;  %v640_v48 = vpop.xlane.xlu1 %639 }
 0x28c   :  { %v315_v25 = vsub.f32 %v247_v55, %v286_v24  ;;  %v669_v46 = vsub.f32 %v1534_v56, %v640_v48  ;;  %v625_v56 = vpop.f32.mrf.mxu3  ;;  %v1676_v24 = vld [vmem:[%s1971_s4 + $0x70] sm:$0xff] }
 0x28e   :  { %v1582_v26 = vpop.eup %1186  ;;  %v333_v27 = vmul.f32 1.442695, %v315_v25  ;;  %v687_v53 = vmul.f32 1.442695, %v669_v46 }
 0x28f   :  { %v1584_v28 = vpop.eup %1188  ;;  %717 = vadd.xlane.f32.xlu0 %v1582_v26 }
 0x290   :  { %1190 = vpow2.f32 %v333_v27  ;;  %363 = vadd.xlane.f32.xlu1 %v1584_v28 }
 0x291   :  { %791 = vrot.lane.b32.xlu2 %v1416_v35, %s1314_s30  ;;  %v1603_v35 = vld [vmem:[%s1971_s4 + $0x40] sm:$0xff] }
 0x292   :  { %v1606_v39 = vadd.f32 %v615_v38, %v1603_v35 }
 0x293   :  { %v288_v29 = vpop.xlane.xlu2 %287  ;;  %v642_v40 = vpop.xlane.xlu0 %641 }
 0x294   :  { %v316_v31 = vsub.f32 %v249_v60, %v288_v29  ;;  %v670_v43 = vsub.f32 %v1540_v61, %v642_v40  ;;  %v54_v61 = vld [vmem:[%s1971_s4 + $0x48] sm:$0xff]  ;;  %v627_v10 = vpop.f32.mrf.mxu3  ;;  %v1694_v40 = vld [vmem:[%s1971_s4 + $0x78] sm:$0xff] }
 0x295   :  { %v1633_v63 = vadd.f32 %v617_v41, %v54_v61  ;;  %v1662_v18 = vadd.f32 %v627_v10, %v1659_v16 }
 0x296   :  { %v1590_v32 = vpop.eup %1190  ;;  %v335_v34 = vmul.f32 1.442695, %v316_v31  ;;  %v689_v30 = vmul.f32 1.442695, %v670_v43 }
 0x298   :  { %1192 = vpow2.f32 %v335_v34  ;;  %365 = vadd.xlane.f32.xlu1 %v1590_v32 }
 0x299   :  { %1194 = vpow2.f32 %v689_v30 }
 0x29a   :  { %1196 = vpow2.f32 %v687_v53 }
 0x29b   :  { %v644_v54 = vpop.xlane.xlu0 %643 }
 0x29c   :  { %v671_v55 = vsub.f32 %v1549_v0, %v644_v54  ;;  %v630_v20 = vpop.f32.mrf.mxu3 }
 0x29d   :  { %v1679_v25 = vadd.f32 %v630_v20, %v1676_v24 }
 0x29e   :  { %v1593_v36 = vpop.eup %1192  ;;  %v691_v59 = vmul.f32 1.442695, %v671_v55 }
 0x29f   :  { %367 = vadd.xlane.f32.xlu0 %v1593_v36  ;;  %v1613_v47 = vpop.eup %1194 }
 0x2a0   :  { %v1627_v60 = vpop.eup %1196  ;;  %1198 = vpow2.f32 %v691_v59 }
 0x2a3   :  { %v646_v0 = vpop.xlane.xlu2 %645 }
 0x2a4   :  { %v672_v23 = vsub.f32 %v1555_v3, %v646_v0  ;;  %v632_v37 = vpop.f32.mrf.mxu3 }
 0x2a6   :  { %v1645_v8 = vpop.eup %1198  ;;  %v693_v29 = vmul.f32 1.442695, %v672_v23 }
 0x2b1   :  { %787 = vrot.lane.b32.xlu1 %v1432_v45, %s1314_s30  ;;  %v1610_v45 = vadd.f32 %v253_v33, %v50_v1  ;;  %v1640_v1 = vld [vmem:[%s1971_s4 + $0x60] sm:$0xff]  ;;  %v1697_v33 = vadd.f32 %v632_v37, %v1694_v40  ;;  %s1315_s4 = smov 16  }
 0x2b2   :  { %v1643_v2 = vadd.f32 %v625_v56, %v1640_v1 }
 0x2b3   :  { %789 = vrot.lane.b32.xlu0 %v1446_v49, %s1314_s30  ;;  %v256_v49 = vpop.f32.mrf.mxu1  ;;  %v650_v14 = vpop.xlane.xlu2 %649 }
 0x2b4   :  { %v1685_v31 = vadd.f32 %v256_v49, %v1561_v4  ;;  %v674_v43 = vsub.f32 %v1573_v9, %v650_v14 }
 0x2b6   :  { %v697_v30 = vmul.f32 1.442695, %v674_v43 }
 0x2ba   :  { %651 = vmax.xlane.f32.xlu2 %v1606_v39 }
 0x2bb   :  { %v258_v50 = vpop.f32.mrf.mxu1 }
 0x2bc   :  { %v1625_v58 = vadd.f32 %v258_v50, %v1570_v7  ;;  %v648_v7 = vpop.xlane.xlu0 %647 }
 0x2bd   :  { %v673_v12 = vsub.f32 %v1564_v6, %v648_v7 }
 0x2bf   :  { %v695_v17 = vmul.f32 1.442695, %v673_v12 }
 0x2c1   :  { %1200 = vpow2.f32 %v695_v17 }
 0x2c2   :  { %291 = vmax.xlane.f32.xlu2 %v1610_v45  ;;  %1202 = vpow2.f32 %v693_v29 }
 0x2c3   :  { %v261_v57 = vpop.f32.mrf.mxu1 }
 0x2c4   :  { %v1706_v49 = vadd.f32 %v261_v57, %v1603_v35 }
 0x2c7   :  { %v1681_v27 = vpop.eup %1200 }
 0x2c8   :  { %v1701_v41 = vpop.eup %1202 }
 0x2ca   :  { %721 = vadd.xlane.f32.xlu2 %v1613_v47 }
 0x2cb   :  { %v263_v5 = vpop.f32.mrf.mxu1 }
 0x2cc   :  { %v1654_v15 = vadd.f32 %v263_v5, %v54_v61 }
 0x2d2   :  { %657 = vmax.xlane.f32.xlu2 %v1620_v52 }
 0x2d3   :  { %v266_v6 = vpop.f32.mrf.mxu1 }
 0x2d4   :  { %v1714_v55 = vadd.f32 %v266_v6, %v55_v62 }
 0x2da   :  { %295 = vmax.xlane.f32.xlu2 %v1625_v58 }
 0x2db   :  { %719 = vadd.xlane.f32.xlu1 %v1627_v60  ;;  %v268_v3 = vpop.f32.mrf.mxu1 }
 0x2dc   :  { %v1689_v38 = vadd.f32 %v268_v3, %v56_v51 }
 0x2dd   :  { %653 = vmax.xlane.f32.xlu0 %v1633_v63 }
 0x2e2   :  { %659 = vmax.xlane.f32.xlu2 %v1643_v2 }
 0x2e3   :  { %723 = vadd.xlane.f32.xlu1 %v1645_v8 }
 0x2e5   :  { %289 = vmax.xlane.f32.xlu0 %v1649_v11 }
 0x2ea   :  { %299 = vmax.xlane.f32.xlu2 %v1654_v15 }
 0x2eb   :  { %661 = vmax.xlane.f32.xlu1 %v1662_v18 }
 0x2ec   :  { %v362_v22 = vpop.xlane.xlu2 %361 }
 0x2ed   :  { %655 = vmax.xlane.f32.xlu0 %v1668_v19  ;;  %1204 = vrcp.f32 %v362_v22 }
 0x2f2   :  { %663 = vmax.xlane.f32.xlu2 %v1679_v25 }
 0x2f3   :  { %727 = vadd.xlane.f32.xlu1 %v1681_v27  ;;  %v1205_v48 = vpop.eup %1204 }
 0x2f4   :  { %v792_v34 = vpop.permute.xlu2 %791  ;;  %v409_v42 = vmul.f32 %v1205_v48, %v1576_v13 }
 0x2f5   :  { %293 = vmax.xlane.f32.xlu0 %v1685_v31  ;;  %816 = vmatpush.bf16.msra.mxu0 %v792_v34 }
 0x2fa   :  { %v716_v4 = vpop.xlane.xlu1 %715  ;;  %303 = vmax.xlane.f32.xlu2 %v1689_v38 }
 0x2fb   :  { %665 = vmax.xlane.f32.xlu1 %v1697_v33 }
 0x2fd   :  { %725 = vadd.xlane.f32.xlu0 %v1701_v41 }
 0x302   :  { %v718_v50 = vpop.xlane.xlu0 %717 }
 0x303   :  { %v364_v44 = vpop.xlane.xlu1 %363 }
 0x304   :  { %1206 = vrcp.f32 %v364_v44 }
 0x305   :  { %297 = vmax.xlane.f32.xlu0 %v1706_v49  ;;  %1208 = vpow2.f32 %v697_v30 }
 0x30a   :  { %v1207_v46 = vpop.eup %1206 }
 0x30b   :  { %v410_v51 = vmul.f32 %v1207_v46, %v1584_v28  ;;  %v1711_v53 = vpop.eup %1208  ;;  %v366_v54 = vpop.xlane.xlu1 %365 }
 0x30c   :  { %1210 = vrcp.f32 %v366_v54  ;;  %v271_v46 = vpop.f32.mrf.mxu1 }
 0x30d   :  { %729 = vadd.xlane.f32.xlu0 %v1711_v53  ;;  %v425_v9 = vpack.c.bf16 %v410_v51, %v409_v42 }
 0x30f   :  { %465 = vmatmul.bf16.vlgmr.msrb.gmra.mxu0 %v425_v9 }
 0x312   :  { %v368_v35 = vpop.xlane.xlu0 %367  ;;  %v1211_v57 = vpop.eup %1210 }
 0x313   :  { %1212 = vrcp.f32 %v368_v35  ;;  %v411_v13 = vmul.f32 %v1211_v57, %v1590_v32  ;;  %v1739_v57 = vadd.f32 %v271_v46, %v1640_v1 }
 0x314   :  { %1214 = vrcp.f32 %v718_v50 }
 0x315   :  { %301 = vmax.xlane.f32.xlu0 %v1714_v55  ;;  %1216 = vrcp.f32 %v716_v4 }
 0x319   :  { %v1213_v56 = vpop.eup %1212 }
 0x31a   :  { %v412_v28 = vmul.f32 %v1213_v56, %v1593_v36  ;;  %v1215_v0 = vpop.eup %1214 }
 0x31b   :  { %v1217_v5 = vpop.eup %1216  ;;  %v764_v7 = vmul.f32 %v1215_v0, %v1582_v26 }
 0x31c   :  { %v426_v59 = vpack.c.bf16 %v412_v28, %v411_v13  ;;  %v763_v12 = vmul.f32 %v1217_v5, %v1579_v21 }
 0x31e   :  { %v779_v17 = vpack.c.bf16 %v764_v7, %v763_v12 }
 0x31f   :  { %470 = vmatmul.bf16.gmra.mxu0 %v426_v59 }
 0x323   :  { %v788_v10 = vpop.permute.xlu1 %787 }
 0x325   :  { %v790_v61 = vpop.permute.xlu0 %789 }
 0x326   :  { %817 = vmatpush.bf16.msra.mxu0 %v790_v61 }
 0x32a   :  { %818 = vmatpush.bf16.msra.mxu0 %v788_v10 }
 0x32d   :  { %v652_v14 = vpop.xlane.xlu2 %651 }
 0x32e   :  { %v675_v32 = vsub.f32 %v1606_v39, %v652_v14 }
 0x32f   :  { %819 = vmatmul.bf16.vlgmr.msra.gmra.mxu0 %v779_v17 }
 0x330   :  { %v699_v36 = vmul.f32 1.442695, %v675_v32 }
 0x332   :  { %1218 = vpow2.f32 %v699_v36 }
 0x335   :  { %v292_v62 = vpop.xlane.xlu2 %291 }
 0x336   :  { %v318_v6 = vsub.f32 %v1610_v45, %v292_v62 }
 0x338   :  { %v1723_v20 = vpop.eup %1218  ;;  %v339_v22 = vmul.f32 1.442695, %v318_v6 }
 0x339   :  { %731 = vadd.xlane.f32.xlu1 %v1723_v20 }
 0x33a   :  { %1220 = vpow2.f32 %v339_v22 }
 0x33d   :  { %v722_v26 = vpop.xlane.xlu2 %721 }
 0x33e   :  { %1222 = vrcp.f32 %v722_v26 }
 0x340   :  { %v1726_v23 = vpop.eup %1220 }
 0x341   :  { %371 = vadd.xlane.f32.xlu1 %v1726_v23 }
 0x344   :  { %v1223_v45 = vpop.eup %1222 }
 0x345   :  { %v658_v21 = vpop.xlane.xlu2 %657  ;;  %v766_v30 = vmul.f32 %v1223_v45, %v1613_v47 }
 0x34d   :  { %v296_v34 = vpop.xlane.xlu2 %295 }
 0x34e   :  { %v720_v39 = vpop.xlane.xlu1 %719  ;;  %v320_v28 = vsub.f32 %v1625_v58, %v296_v34 }
 0x34f   :  { %1224 = vrcp.f32 %v720_v39 }
 0x350   :  { %v654_v29 = vpop.xlane.xlu0 %653  ;;  %v343_v5 = vmul.f32 1.442695, %v320_v28 }
 0x351   :  { %v676_v3 = vsub.f32 %v1633_v63, %v654_v29  ;;  %v678_v63 = vsub.f32 %v1620_v52, %v658_v21 }
 0x353   :  { %v701_v37 = vmul.f32 1.442695, %v676_v3  ;;  %v705_v35 = vmul.f32 1.442695, %v678_v63 }
 0x355   :  { %v1225_v4 = vpop.eup %1224  ;;  %1226 = vpow2.f32 %v701_v37  ;;  %v660_v51 = vpop.xlane.xlu2 %659 }
 0x356   :  { %v765_v43 = vmul.f32 %v1225_v4, %v1627_v60  ;;  %v724_v54 = vpop.xlane.xlu1 %723 }
 0x358   :  { %v290_v44 = vpop.xlane.xlu0 %289  ;;  %v780_v48 = vpack.c.bf16 %v766_v30, %v765_v43 }
 0x359   :  { %v317_v50 = vsub.f32 %v1649_v11, %v290_v44  ;;  %v273_v11 = vpop.f32.mrf.mxu1 }
 0x35a   :  { %824 = vmatmul.bf16.gmra.mxu0 %v780_v48  ;;  %v1750_v1 = vadd.f32 %v273_v11, %v1659_v16 }
 0x35b   :  { %v1733_v42 = vpop.eup %1226  ;;  %v337_v9 = vmul.f32 1.442695, %v317_v50 }
 0x35c   :  { %733 = vadd.xlane.f32.xlu0 %v1733_v42 }
 0x35d   :  { %1228 = vpow2.f32 %v337_v9  ;;  %v300_v52 = vpop.xlane.xlu2 %299 }
 0x35e   :  { %1230 = vpow2.f32 %v705_v35  ;;  %v662_v59 = vpop.xlane.xlu1 %661  ;;  %v322_v26 = vsub.f32 %v1654_v15, %v300_v52 }
 0x35f   :  { %v680_v58 = vsub.f32 %v1662_v18, %v662_v59 }
 0x360   :  { %v656_v60 = vpop.xlane.xlu0 %655  ;;  %v347_v4 = vmul.f32 1.442695, %v322_v26 }
 0x361   :  { %v677_v47 = vsub.f32 %v1668_v19, %v656_v60  ;;  %v276_v12 = vpop.f32.mrf.mxu1  ;;  %v709_v32 = vmul.f32 1.442695, %v680_v58 }
 0x362   :  { %v1760_v36 = vadd.f32 %v276_v12, %v1676_v24 }
 0x363   :  { %v1741_v56 = vpop.eup %1228  ;;  %v703_v13 = vmul.f32 1.442695, %v677_v47 }
 0x364   :  { %305 = vmax.xlane.f32.xlu0 %v1739_v57  ;;  %369 = vadd.xlane.f32.xlu2 %v1741_v56  ;;  %v1747_v0 = vpop.eup %1230 }
 0x365   :  { %1232 = vpow2.f32 %v703_v13  ;;  %v664_v16 = vpop.xlane.xlu2 %663 }
 0x366   :  { %v728_v14 = vpop.xlane.xlu1 %727  ;;  %v681_v18 = vsub.f32 %v1679_v25, %v664_v16 }
 0x368   :  { %v294_v61 = vpop.xlane.xlu0 %293  ;;  %v711_v39 = vmul.f32 1.442695, %v681_v18 }
 0x369   :  { %v319_v19 = vsub.f32 %v1685_v31, %v294_v61  ;;  %v679_v31 = vsub.f32 %v1643_v2, %v660_v51  ;;  %v278_v21 = vpop.f32.mrf.mxu1 }
 0x36a   :  { %v1775_v37 = vadd.f32 %v278_v21, %v1694_v40 }
 0x36b   :  { %v1752_v7 = vpop.eup %1232  ;;  %v341_v10 = vmul.f32 1.442695, %v319_v19  ;;  %v707_v62 = vmul.f32 1.442695, %v679_v31 }
 0x36c   :  { %737 = vadd.xlane.f32.xlu0 %v1747_v0  ;;  %307 = vmax.xlane.f32.xlu2 %v1750_v1 }
 0x36d   :  { %1234 = vpow2.f32 %v341_v10  ;;  %735 = vadd.xlane.f32.xlu1 %v1752_v7  ;;  %v304_v25 = vpop.xlane.xlu2 %303 }
 0x36e   :  { %1236 = vpow2.f32 %v343_v5  ;;  %v666_v43 = vpop.xlane.xlu1 %665  ;;  %v324_v46 = vsub.f32 %v1689_v38, %v304_v25 }
 0x36f   :  { %1238 = vrcp.f32 %v724_v54 }
 0x370   :  { %v726_v17 = vpop.xlane.xlu0 %725  ;;  %v351_v40 = vmul.f32 1.442695, %v324_v46 }
 0x371   :  { %1240 = vrcp.f32 %v726_v17 }
 0x372   :  { %1242 = vpow2.f32 %v709_v32 }
 0x373   :  { %v1762_v6 = vpop.eup %1234  ;;  %1244 = vpow2.f32 %v707_v62 }
 0x374   :  { %v1764_v22 = vpop.eup %1236  ;;  %309 = vmax.xlane.f32.xlu0 %v1760_v36  ;;  %373 = vadd.xlane.f32.xlu2 %v1762_v6  ;;  %1246 = vpow2.f32 %v711_v39 }
 0x375   :  { %v1239_v2 = vpop.eup %1238  ;;  %375 = vadd.xlane.f32.xlu1 %v1764_v22 }
 0x376   :  { %v767_v34 = vmul.f32 %v1239_v2, %v1645_v8  ;;  %v682_v8 = vsub.f32 %v1697_v33, %v666_v43 }
 0x377   :  { %v1241_v24 = vpop.eup %1240 }
 0x378   :  { %v298_v29 = vpop.xlane.xlu0 %297  ;;  %v768_v3 = vmul.f32 %v1241_v24, %v1701_v41  ;;  %v1777_v44 = vpop.eup %1242 }
 0x379   :  { %v321_v45 = vsub.f32 %v1706_v49, %v298_v29  ;;  %v1779_v48 = vpop.eup %1244  ;;  %v713_v49 = vmul.f32 1.442695, %v682_v8 }
 0x37a   :  { %v781_v30 = vpack.c.bf16 %v768_v3, %v767_v34  ;;  %v1786_v50 = vpop.eup %1246 }
 0x37b   :  { %v345_v15 = vmul.f32 1.442695, %v321_v45 }
 0x37c   :  { %741 = vadd.xlane.f32.xlu0 %v1777_v44  ;;  %311 = vmax.xlane.f32.xlu2 %v1775_v37 }
 0x37d   :  { %1248 = vpow2.f32 %v345_v15  ;;  %739 = vadd.xlane.f32.xlu1 %v1779_v48  ;;  %829 = vmatmul.bf16.gmra.mxu0 %v781_v30 }
 0x37e   :  { %1250 = vpow2.f32 %v347_v4 }
 0x37f   :  { %1252 = vrcp.f32 %v728_v14 }
 0x380   :  { %v730_v41 = vpop.xlane.xlu0 %729 }
 0x381   :  { %1254 = vrcp.f32 %v730_v41 }
 0x382   :  { %1256 = vpow2.f32 %v351_v40 }
 0x383   :  { %v1788_v51 = vpop.eup %1248  ;;  %1258 = vpow2.f32 %v713_v49 }
 0x384   :  { %v1790_v38 = vpop.eup %1250  ;;  %743 = vadd.xlane.f32.xlu0 %v1786_v50  ;;  %377 = vadd.xlane.f32.xlu2 %v1788_v51 }
 0x385   :  { %v1253_v33 = vpop.eup %1252  ;;  %379 = vadd.xlane.f32.xlu1 %v1790_v38 }
 0x386   :  { %v769_v54 = vmul.f32 %v1253_v33, %v1681_v27 }
 0x387   :  { %v1255_v9 = vpop.eup %1254 }
 0x388   :  { %v302_v63 = vpop.xlane.xlu0 %301  ;;  %v770_v35 = vmul.f32 %v1255_v9, %v1711_v53  ;;  %v1798_v47 = vpop.eup %1256 }
 0x389   :  { %v323_v60 = vsub.f32 %v1714_v55, %v302_v63  ;;  %v1800_v13 = vpop.eup %1258 }
 0x38a   :  { %v782_v11 = vpack.c.bf16 %v770_v35, %v769_v54 }
 0x38b   :  { %v349_v52 = vmul.f32 1.442695, %v323_v60 }
 0x38c   :  { %v1802_v28 = vpop.f32.mrf.mxu0  ;;  %383 = vadd.xlane.f32.xlu0 %v1798_v47  ;;  %745 = vadd.xlane.f32.xlu2 %v1800_v13 }
 0x38d   :  { %1260 = vpow2.f32 %v349_v52  ;;  %834 = vmatmul.bf16.gmra.mxu0 %v782_v11 }
 0x393   :  { %v1806_v59 = vpop.eup %1260 }
 0x394   :  { %v1808_v27 = vpop.f32.mrf.mxu0  ;;  %381 = vadd.xlane.f32.xlu1 %v1806_v59 }
 0x39c   :  { %v1811_v53 = vpop.f32.mrf.mxu0 }
 0x3a4   :  { %v1813_v55 = vpop.f32.mrf.mxu0 }
 0x3ac   :  { %v1815_v61 = vpop.f32.mrf.mxu0  ;;  %v732_v10 = vpop.xlane.xlu1 %731 }
 0x3ad   :  { %1262 = vrcp.f32 %v732_v10 }
 0x3b3   :  { %v1263_v31 = vpop.eup %1262 }
 0x3b4   :  { %v1817_v19 = vpop.f32.mrf.mxu0  ;;  %v372_v58 = vpop.xlane.xlu1 %371  ;;  %v771_v17 = vmul.f32 %v1263_v31, %v1723_v20 }
 0x3b5   :  { %v1176_v5 = vpack.i.bf16 %v1817_v19, %v1815_v61 }
 0x3cf   :  { %v734_v12 = vpop.xlane.xlu0 %733 }
 0x3d0   :  { %1264 = vrcp.f32 %v734_v12 }
 0x3d1   :  { %1266 = vrcp.f32 %v372_v58 }
 0x3d6   :  { %v1265_v16 = vpop.eup %1264 }
 0x3d7   :  { %v370_v14 = vpop.xlane.xlu2 %369  ;;  %v772_v32 = vmul.f32 %v1265_v16, %v1733_v42  ;;  %v306_v62 = vpop.xlane.xlu0 %305 }
 0x3d8   :  { %1268 = vrcp.f32 %v370_v14  ;;  %v325_v18 = vsub.f32 %v1739_v57, %v306_v62  ;;  %v1267_v24 = vpop.eup %1266  ;;  %v825_v43 = vpop.f32.mrf.mxu0 }
 0x3d9   :  { %v783_v2 = vpack.c.bf16 %v772_v32, %v771_v17  ;;  %v414_v39 = vmul.f32 %v1267_v24, %v1726_v23 }
 0x3da   :  { %v353_v26 = vmul.f32 1.442695, %v325_v18 }
 0x3db   :  { %839 = vmatmul.bf16.gmra.mxu0 %v783_v2 }
 0x3dc   :  { %1270 = vpow2.f32 %v353_v26 }
 0x3de   :  { %v1269_v21 = vpop.eup %1268 }
 0x3df   :  { %v413_v29 = vmul.f32 %v1269_v21, %v1741_v56  ;;  %v308_v34 = vpop.xlane.xlu2 %307  ;;  %v738_v25 = vpop.xlane.xlu0 %737 }
 0x3e0   :  { %v326_v3 = vsub.f32 %v1750_v1, %v308_v34  ;;  %v736_v20 = vpop.xlane.xlu1 %735 }
 0x3e1   :  { %1272 = vrcp.f32 %v736_v20  ;;  %v427_v42 = vpack.c.bf16 %v414_v39, %v413_v29 }
 0x3e2   :  { %v355_v45 = vmul.f32 1.442695, %v326_v3  ;;  %1274 = vrcp.f32 %v738_v25  ;;  %v1827_v57 = vpop.eup %1270 }
 0x3e3   :  { %475 = vmatmul.bf16.vlgmr.msra.gmra.mxu1 %v427_v42  ;;  %385 = vadd.xlane.f32.xlu2 %v1827_v57 }
 0x3e4   :  { %1276 = vpow2.f32 %v355_v45 }
 0x3e7   :  { %v1273_v4 = vpop.eup %1272  ;;  %v374_v23 = vpop.xlane.xlu2 %373 }
 0x3e8   :  { %v1275_v30 = vpop.eup %1274  ;;  %v376_v56 = vpop.xlane.xlu1 %375  ;;  %1278 = vrcp.f32 %v374_v23  ;;  %v773_v1 = vmul.f32 %v1273_v4, %v1752_v7 }
 0x3e9   :  { %v310_v15 = vpop.xlane.xlu0 %309  ;;  %1280 = vrcp.f32 %v376_v56  ;;  %v774_v8 = vmul.f32 %v1275_v30, %v1747_v0  ;;  %v827_v0 = vpop.f32.mrf.mxu0 }
 0x3ea   :  { %v327_v46 = vsub.f32 %v1760_v36, %v310_v15  ;;  %v1833_v40 = vpop.eup %1276  ;;  %v1141_v24 = vpack.i.bf16 %v827_v0, %v825_v43 }
 0x3eb   :  { %387 = vadd.xlane.f32.xlu1 %v1833_v40  ;;  %v784_v49 = vpack.c.bf16 %v774_v8, %v773_v1 }
 0x3ec   :  { %v357_v41 = vmul.f32 1.442695, %v327_v46 }
 0x3ed   :  { %844 = vmatmul.bf16.gmra.mxu0 %v784_v49  ;;  %v1111_v49 = vld [vmem:[%s1972_s2] sm:$0xff] }
 0x3ee   :  { %1282 = vpow2.f32 %v357_v41  ;;  %v1279_v33 = vpop.eup %1278 }
 0x3ef   :  { %v1281_v9 = vpop.eup %1280  ;;  %v312_v63 = vpop.xlane.xlu2 %311  ;;  %v415_v54 = vmul.f32 %v1279_v33, %v1762_v6 }
 0x3f0   :  { %v740_v35 = vpop.xlane.xlu1 %739  ;;  %v328_v7 = vsub.f32 %v1775_v37, %v312_v63  ;;  %v416_v36 = vmul.f32 %v1281_v9, %v1764_v22 }
 0x3f1   :  { %v742_v60 = vpop.xlane.xlu0 %741  ;;  %1284 = vrcp.f32 %v740_v35 }
 0x3f2   :  { %v359_v11 = vmul.f32 1.442695, %v328_v7  ;;  %1286 = vrcp.f32 %v742_v60  ;;  %v428_v52 = vpack.c.bf16 %v416_v36, %v415_v54 }
 0x3f4   :  { %v1839_v10 = vpop.eup %1282  ;;  %1288 = vpow2.f32 %v359_v11  ;;  %480 = vmatmul.bf16.vlgmr.msra.gmra.mxu2 %v428_v52 }
 0x3f5   :  { %389 = vadd.xlane.f32.xlu0 %v1839_v10 }
 0x3f7   :  { %v1285_v12 = vpop.eup %1284  ;;  %v378_v58 = vpop.xlane.xlu2 %377 }
 0x3f8   :  { %v1287_v6 = vpop.eup %1286  ;;  %v380_v31 = vpop.xlane.xlu1 %379  ;;  %1290 = vrcp.f32 %v378_v58  ;;  %v775_v37 = vmul.f32 %v1285_v12, %v1779_v48 }
 0x3f9   :  { %1292 = vrcp.f32 %v380_v31  ;;  %v744_v22 = vpop.xlane.xlu0 %743  ;;  %v776_v16 = vmul.f32 %v1287_v6, %v1777_v44 }
 0x3fa   :  { %v1844_v14 = vpop.eup %1288  ;;  %v830_v17 = vpop.f32.mrf.mxu0  ;;  %1294 = vrcp.f32 %v744_v22 }
 0x3fb   :  { %391 = vadd.xlane.f32.xlu2 %v1844_v14  ;;  %v785_v32 = vpack.c.bf16 %v776_v16, %v775_v37 }
 0x3fd   :  { %849 = vmatmul.bf16.gmra.mxu0 %v785_v32 }
 0x3fe   :  { %v1291_v62 = vpop.eup %1290 }
 0x3ff   :  { %v1293_v18 = vpop.eup %1292  ;;  %v746_v2 = vpop.xlane.xlu2 %745  ;;  %v417_v26 = vmul.f32 %v1291_v62, %v1788_v51 }
 0x400   :  { %1296 = vrcp.f32 %v746_v2  ;;  %v418_v48 = vmul.f32 %v1293_v18, %v1790_v38  ;;  %v1295_v29 = vpop.eup %1294 }
 0x401   :  { %v384_v44 = vpop.xlane.xlu0 %383  ;;  %v777_v25 = vmul.f32 %v1295_v29, %v1786_v50  ;;  %v1112_v50 = vld [vmem:[%s1972_s2 + $0x8] sm:$0xff] }
 0x402   :  { %v832_v21 = vpop.f32.mrf.mxu0  ;;  %v429_v39 = vpack.c.bf16 %v418_v48, %v417_v26  ;;  %1298 = vrcp.f32 %v384_v44  ;;  %1133 = vmatpush.bf16.msrb.mxu2 %v1112_v50  ;;  %998 = vmatpush.bf16.msrb.mxu0 %v1112_v50 }
 0x403   :  { %v1146_v3 = vpack.i.bf16 %v832_v21, %v830_v17 }
 0x404   :  { %485 = vmatmul.bf16.gmra.mxu2 %v429_v39  ;;  %1142 = vrot.lane.b32.xlu1 %v1141_v24, %s1315_s4 }
 0x406   :  { %v1297_v34 = vpop.eup %1296  ;;  %1134 = vmatpush.bf16.msrb.mxu2 %v1111_v49  ;;  %999 = vmatpush.bf16.msrb.mxu0 %v1111_v49 }
 0x407   :  { %v382_v20 = vpop.xlane.xlu1 %381  ;;  %v778_v51 = vmul.f32 %v1297_v34, %v1800_v13 }
 0x408   :  { %1300 = vrcp.f32 %v382_v20  ;;  %v1299_v45 = vpop.eup %1298 }
 0x409   :  { %1147 = vrot.lane.b32.xlu0 %v1146_v3, %s1315_s4  ;;  %v786_v38 = vpack.c.bf16 %v778_v51, %v777_v25  ;;  %v420_v23 = vmul.f32 %v1299_v45, %v1798_v47 }
 0x40a   :  { %v835_v42 = vpop.f32.mrf.mxu0 }
 0x40d   :  { %854 = vmatmul.bf16.gmra.mxu0 %v786_v38 }
 0x40e   :  { %v1301_v4 = vpop.eup %1300 }
 0x40f   :  { %v419_v43 = vmul.f32 %v1301_v4, %v1806_v59 }
 0x411   :  { %v430_v30 = vpack.c.bf16 %v420_v23, %v419_v43 }
 0x412   :  { %v837_v56 = vpop.f32.mrf.mxu0 }
 0x413   :  { %v1151_v15 = vpack.i.bf16 %v837_v56, %v835_v42 }
 0x414   :  { %490 = vmatmul.bf16.gmra.mxu2 %v430_v30 }
 0x415   :  { %1152 = vrot.lane.b32.xlu2 %v1151_v15, %s1315_s4 }
 0x456   :  { %v386_v1 = vpop.xlane.xlu2 %385 }
 0x457   :  { %1302 = vrcp.f32 %v386_v1 }
 0x458   :  { %v840_v13 = vpop.f32.mrf.mxu0 }
 0x45d   :  { %v1303_v47 = vpop.eup %1302 }
 0x45e   :  { %v388_v46 = vpop.xlane.xlu1 %387  ;;  %v421_v33 = vmul.f32 %v1303_v47, %v1827_v57 }
 0x45f   :  { %1304 = vrcp.f32 %v388_v46 }
 0x460   :  { %v842_v59 = vpop.f32.mrf.mxu0  ;;  %v476_v17 = vpop.f32.mrf.mxu1 }
 0x461   :  { %v1156_v8 = vpack.i.bf16 %v842_v59, %v840_v13 }
 0x463   :  { %1157 = vrot.lane.b32.xlu0 %v1156_v8, %s1315_s4 }
 0x465   :  { %v1305_v41 = vpop.eup %1304 }
 0x466   :  { %v422_v9 = vmul.f32 %v1305_v41, %v1833_v40 }
 0x468   :  { %v431_v63 = vpack.c.bf16 %v422_v9, %v421_v33  ;;  %v390_v54 = vpop.xlane.xlu0 %389  ;;  %v478_v2 = vpop.f32.mrf.mxu1 }
 0x469   :  { %1306 = vrcp.f32 %v390_v54 }
 0x46a   :  { %v845_v35 = vpop.f32.mrf.mxu0  ;;  %495 = vmatmul.bf16.gmra.mxu2 %v431_v63 }
 0x46e   :  { %v392_v7 = vpop.xlane.xlu2 %391 }
 0x46f   :  { %1308 = vrcp.f32 %v392_v7  ;;  %v1307_v36 = vpop.eup %1306 }
 0x470   :  { %v423_v52 = vmul.f32 %v1307_v36, %v1839_v10 }
 0x472   :  { %v847_v60 = vpop.f32.mrf.mxu0 }
 0x473   :  { %v1161_v0 = vpack.i.bf16 %v847_v60, %v845_v35 }
 0x475   :  { %v1309_v11 = vpop.eup %1308  ;;  %1162 = vrot.lane.b32.xlu1 %v1161_v0, %s1315_s4 }
 0x476   :  { %v424_v57 = vmul.f32 %v1309_v11, %v1844_v14  ;;  %v1143_v58 = vpop.permute.xlu1 %1142  ;;  %v1153_v24 = vpop.permute.xlu2 %1152 }
 0x477   :  { %v1145_v6 = vunpack.i.h.bf16 %v1143_v58  ;;  %v1144_v31 = vunpack.i.l.bf16 %v1143_v58  ;;  %v1155_v39 = vunpack.i.h.bf16 %v1153_v24  ;;  %v1154_v44 = vunpack.i.l.bf16 %v1153_v24  ;;  %v1181_v58 = vld [vmem:[%s1973_s3] ss:$0 sm:$0xff] }
 0x478   :  { %v432_v40 = vpack.c.bf16 %v424_v57, %v423_v52 }
 0x479   :  { %v927_v16 = vsel %vm183_vm1, %v1813_v55, %v1145_v6  ;;  %v926_v10 = vsel %vm183_vm1, %v1811_v53, %v1144_v31  ;;  %v481_v53 = vpop.f32.mrf.mxu2 }
 0x47a   :  { %v850_v12 = vpop.f32.mrf.mxu0  ;;  %500 = vmatmul.bf16.gmra.mxu2 %v432_v40  ;;  %v941_v14 = vpack.c.bf16 %v927_v16, %v926_v10  ;;  %v930_v34 = vsel %vm183_vm1, %v481_v53, %v1154_v44 }
 0x47b   :  { %v1148_v61 = vpop.permute.xlu0 %1147 }
 0x47c   :  { %v1150_v19 = vunpack.i.h.bf16 %v1148_v61 }
 0x47d   :  { %1177 = vrot.lane.b32.xlu1 %v1176_v5, %s1315_s4  ;;  %v1149_v5 = vunpack.i.l.bf16 %v1148_v61 }
 0x47e   :  { %v929_v26 = vsel %vm183_vm1, %v478_v2, %v1150_v19 }
 0x47f   :  { %v928_v55 = vsel %vm183_vm1, %v476_v17, %v1149_v5 }
 0x480   :  { %v942_v48 = vpack.c.bf16 %v929_v26, %v928_v55 }
 0x481   :  { %v483_v21 = vpop.f32.mrf.mxu2 }
 0x482   :  { %v852_v37 = vpop.f32.mrf.mxu0  ;;  %v931_v29 = vsel %vm183_vm1, %v483_v21, %v1155_v39 }
 0x483   :  { %v1166_v22 = vpack.i.bf16 %v852_v37, %v850_v12  ;;  %v943_v3 = vpack.c.bf16 %v931_v29, %v930_v34 }
 0x485   :  { %1167 = vrot.lane.b32.xlu2 %v1166_v22, %s1315_s4 }
 0x489   :  { %v486_v20 = vpop.f32.mrf.mxu2 }
 0x48a   :  { %v855_v32 = vpop.f32.mrf.mxu0  ;;  %1102 = vmatmul.msk.bf16.vlgmr.msrb.gmra.mxu2 %vm77_vm0, %v941_v14 }
 0x491   :  { %v488_v25 = vpop.f32.mrf.mxu2 }
 0x492   :  { %v857_v62 = vpop.f32.mrf.mxu0 }
 0x493   :  { %v1171_v18 = vpack.i.bf16 %v857_v62, %v855_v32 }
 0x495   :  { %1172 = vrot.lane.b32.xlu0 %v1171_v18, %s1315_s4 }
 0x499   :  { %v491_v23 = vpop.f32.mrf.mxu2 }
 0x49a   :  { %1103 = vmatmul.msk.bf16.gmra.mxu2 %vm77_vm0, %v942_v48 }
 0x4a1   :  { %v493_v30 = vpop.f32.mrf.mxu2 }
 0x4aa   :  { %1104 = vmatmul.msk.bf16.gmra.mxu2 %vm77_vm0, %v943_v3 }
 0x4d5   :  { %v1158_v51 = vpop.permute.xlu0 %1157 }
 0x4d6   :  { %v1160_v38 = vunpack.i.h.bf16 %v1158_v51  ;;  %v1159_v42 = vunpack.i.l.bf16 %v1158_v51 }
 0x4d8   :  { %v932_v45 = vsel %vm183_vm1, %v486_v20, %v1159_v42  ;;  %v933_v4 = vsel %vm183_vm1, %v488_v25, %v1160_v38 }
 0x4d9   :  { %v944_v43 = vpack.c.bf16 %v933_v4, %v932_v45 }
 0x4db   :  { %1105 = vmatmul.msk.bf16.gmra.mxu2 %vm77_vm0, %v944_v43 }
 0x4df   :  { %v1168_v9 = vpop.permute.xlu2 %1167 }
 0x4e0   :  { %v1170_v35 = vunpack.i.h.bf16 %v1168_v9  ;;  %v1169_v7 = vunpack.i.l.bf16 %v1168_v9 }
 0x4e7   :  { %v1163_v56 = vpop.permute.xlu1 %1162 }
 0x4e8   :  { %v1165_v15 = vunpack.i.h.bf16 %v1163_v56  ;;  %v1164_v50 = vunpack.i.l.bf16 %v1163_v56 }
 0x4ea   :  { %v934_v13 = vsel %vm183_vm1, %v491_v23, %v1164_v50  ;;  %v935_v1 = vsel %vm183_vm1, %v493_v30, %v1165_v15 }
 0x4eb   :  { %v945_v46 = vpack.c.bf16 %v935_v1, %v934_v13 }
 0x4ed   :  { %1106 = vmatmul.msk.bf16.gmra.mxu2 %vm77_vm0, %v945_v46  ;;  %v496_v59 = vpop.f32.mrf.mxu2 }
 0x4ee   :  { %v936_v36 = vsel %vm183_vm1, %v496_v59, %v1169_v7 }
 0x4ef   :  { %v1178_v8 = vpop.permute.xlu1 %1177 }
 0x4f0   :  { %v1180_v47 = vunpack.i.h.bf16 %v1178_v8  ;;  %v1179_v41 = vunpack.i.l.bf16 %v1178_v8 }
 0x4f2   :  { %v925_v49 = vsel %vm183_vm1, %v1808_v27, %v1180_v47  ;;  %v924_v33 = vsel %vm183_vm1, %v1802_v28, %v1179_v41 }
 0x4f3   :  { %v940_v63 = vpack.c.bf16 %v925_v49, %v924_v33 }
 0x4f5   :  { %1101 = vmatmul.msk.bf16.vlgmr.msrb.gmra.mxu0 %vm77_vm0, %v940_v63  ;;  %v498_v54 = vpop.f32.mrf.mxu2 }
 0x4f6   :  { %v937_v60 = vsel %vm183_vm1, %v498_v54, %v1170_v35 }
 0x4f7   :  { %v946_v0 = vpack.c.bf16 %v937_v60, %v936_v36 }
 0x4fd   :  { %1107 = vmatmul.msk.bf16.gmra.mxu2 %vm77_vm0, %v946_v0  ;;  %v501_v11 = vpop.f32.mrf.mxu2 }
 0x505   :  { %v503_v52 = vpop.f32.mrf.mxu2 }
 0x507   :  { %v1173_v27 = vpop.permute.xlu0 %1172 }
 0x508   :  { %v1175_v57 = vunpack.i.h.bf16 %v1173_v27  ;;  %v1174_v40 = vunpack.i.l.bf16 %v1173_v27 }
 0x50a   :  { %v938_v28 = vsel %vm183_vm1, %v501_v11, %v1174_v40  ;;  %v939_v12 = vsel %vm183_vm1, %v503_v52, %v1175_v57 }
 0x50b   :  { %v947_v6 = vpack.c.bf16 %v939_v12, %v938_v28 }
 0x50d   :  { %1108 = vmatmul.msk.bf16.gmra.mxu2 %vm77_vm0, %v947_v6  ;;  %v1006_v31 = vpop.f32.mrf.mxu2 }
 0x50e   :  { %v1007_v37 = vadd.f32 %v1181_v58, %v1006_v31 }
 0x510   :  { %1043 = vst.msk [vmem:[%s1974_s5 + $0x10] sm:$0xff] %vm77_vm0, %v1007_v37 }
 0x515   :  { %v1008_v22 = vpop.f32.mrf.mxu2 }
 0x516   :  { %v1009_v16 = vadd.f32 %v1181_v58, %v1008_v22 }
 0x518   :  { %1044 = vst.msk [vmem:[%s1974_s5 + $0x18] sm:$0xff] %vm77_vm0, %v1009_v16 }
 0x51d   :  { %v1011_v10 = vpop.f32.mrf.mxu2 }
 0x51e   :  { %v1012_v14 = vadd.f32 %v1181_v58, %v1011_v10 }
 0x520   :  { %1045 = vst.msk [vmem:[%s1974_s5 + $0x20] sm:$0xff] %vm77_vm0, %v1012_v14 }
 0x525   :  { %v1013_v17 = vpop.f32.mrf.mxu2 }
 0x526   :  { %v1014_v32 = vadd.f32 %v1181_v58, %v1013_v17 }
 0x528   :  { %1046 = vst.msk [vmem:[%s1974_s5 + $0x28] sm:$0xff] %vm77_vm0, %v1014_v32 }
 0x52d   :  { %v1016_v61 = vpop.f32.mrf.mxu2 }
 0x52e   :  { %v1017_v19 = vadd.f32 %v1181_v58, %v1016_v61 }
 0x530   :  { %1047 = vst.msk [vmem:[%s1974_s5 + $0x30] sm:$0xff] %vm77_vm0, %v1017_v19 }
 0x535   :  { %v1018_v5 = vpop.f32.mrf.mxu2 }
 0x536   :  { %v1019_v62 = vadd.f32 %v1181_v58, %v1018_v5 }
 0x538   :  { %1048 = vst.msk [vmem:[%s1974_s5 + $0x38] sm:$0xff] %vm77_vm0, %v1019_v62 }
 0x55e   :  { %v1021_v18 = vpop.f32.mrf.mxu2 }
 0x55f   :  { %v1022_v2 = vadd.f32 %v1181_v58, %v1021_v18 }
 0x561   :  { %1049 = vst.msk [vmem:[%s1974_s5 + $0x40] sm:$0xff] %vm77_vm0, %v1022_v2 }
 0x566   :  { %v1023_v55 = vpop.f32.mrf.mxu2 }
 0x567   :  { %v1024_v26 = vadd.f32 %v1181_v58, %v1023_v55 }
 0x569   :  { %1050 = vst.msk [vmem:[%s1974_s5 + $0x48] sm:$0xff] %vm77_vm0, %v1024_v26 }
 0x570   :  { %v1026_v53 = vpop.f32.mrf.mxu2 }
 0x571   :  { %v1027_v48 = vadd.f32 %v1181_v58, %v1026_v53 }
 0x572   :  { %v1001_v24 = vpop.f32.mrf.mxu0 }
 0x573   :  { %1051 = vst.msk [vmem:[%s1974_s5 + $0x50] sm:$0xff] %vm77_vm0, %v1027_v48  ;;  %v1002_v21 = vadd.f32 %v1181_v58, %v1001_v24 }
 0x575   :  { %1041 = vst.msk [vmem:[%s1974_s5] sm:$0xff] %vm77_vm0, %v1002_v21 }
 0x578   :  { %v1028_v39 = vpop.f32.mrf.mxu2 }
 0x579   :  { %v1029_v44 = vadd.f32 %v1181_v58, %v1028_v39 }
 0x57a   :  { %v1003_v29 = vpop.f32.mrf.mxu0 }
 0x57b   :  { %1052 = vst.msk [vmem:[%s1974_s5 + $0x58] sm:$0xff] %vm77_vm0, %v1029_v44  ;;  %v1004_v34 = vadd.f32 %v1181_v58, %v1003_v29 }
 0x57d   :  { %1042 = vst.msk [vmem:[%s1974_s5 + $0x8] sm:$0xff] %vm77_vm0, %v1004_v34 }
 0x580   :  { %v1031_v3 = vpop.f32.mrf.mxu2 }
 0x581   :  { %v1032_v20 = vadd.f32 %v1181_v58, %v1031_v3 }
 0x583   :  { %1053 = vst.msk [vmem:[%s1974_s5 + $0x60] sm:$0xff] %vm77_vm0, %v1032_v20 }
 0x588   :  { %v1033_v25 = vpop.f32.mrf.mxu2 }
 0x589   :  { %v1034_v51 = vadd.f32 %v1181_v58, %v1033_v25 }
 0x58b   :  { %1054 = vst.msk [vmem:[%s1974_s5 + $0x68] sm:$0xff] %vm77_vm0, %v1034_v51 }
 0x590   :  { %v1036_v38 = vpop.f32.mrf.mxu2 }
 0x591   :  { %v1037_v42 = vadd.f32 %v1181_v58, %v1036_v38 }
 0x593   :  { %1055 = vst.msk [vmem:[%s1974_s5 + $0x70] sm:$0xff] %vm77_vm0, %v1037_v42 }
 0x598   :  { %v1038_v45 = vpop.f32.mrf.mxu2 }
 0x599   :  { %v1039_v4 = vadd.f32 %v1181_v58, %v1038_v45 }
 0x59b   :  { %1056 = vst.msk [vmem:[%s1974_s5 + $0x78] sm:$0xff] %vm77_vm0, %v1039_v4 }

</bundles_post_ra>
